<compile_context>
chip_gen: v7x
topology: tpu7x:2x2x1
jax: 0.10.0
libtpu: 0.0.40
codegen_flags: <defaults>
</compile_context>

<pallas_src>
import numpy as np
import jax
import jax.numpy as jnp
from jax.experimental import pallas as pl
from jax.experimental.pallas import tpu as pltpu


def _leaky(x, slope=0.2):
    return jnp.where(x > 0, x, slope * x)


def _round_up(c, m=128):
    return ((c + m - 1) // m) * m


def _make_kernel(n_convs, has_out_conv, T):
    """Kernel body: channels-last, channel-padded, batch-flattened."""

    def kernel(x_ref, w0_ref, wr_ref, b_ref, wout_ref, bout_ref, o_ref):
        BB = x_ref.shape[0]
        cin_p = x_ref.shape[2]
        cout_p = o_ref.shape[2]
        BT = BB * T

        xb = x_ref[...].reshape(BT, cin_p)           # bf16 (B*T, Cin_p)
        x = xb.astype(jnp.float32)

        # Hoisted per-sample time index, reused by every shift mask.
        t = jax.lax.broadcasted_iota(jnp.int32, (BT, 1), 0)
        if BB > 1:
            t = (t & (T - 1)) if (T & (T - 1)) == 0 else (t % T)

        def shift(v, s):
            # u[b, t] = v[b, t - s] if 0 <= t - s < T else 0 (v flattened (B*T, C)).
            rolled = pltpu.roll(v, shift=s % BT, axis=0)
            if s > 0:
                return jnp.where(t >= s, rolled, 0.0)
            return jnp.where(t < T + s, rolled, 0.0)

        # Residual path: 1x1 out_conv, or identity when Cin == Cout.
        if has_out_conv:
            base = jnp.dot(xb, wout_ref[...],
                           preferred_element_type=jnp.float32) + bout_ref[...]
        else:
            base = x
        o_ref[...] = base.reshape(BB, T, cout_p)

        y = x
        for i in range(n_convs):                      # static -> fully unrolled
            if i > 0:
                y = _leaky(y)
            d = 2 ** i
            # Fuse the 3 dilated taps into a single K = 3*C matmul.
            xs = jnp.concatenate([shift(y, d), y, shift(y, -d)], axis=-1)
            w = w0_ref[...] if i == 0 else wr_ref[i - 1]
            y = jnp.dot(xs.astype(jnp.bfloat16), w,
                        preferred_element_type=jnp.float32) + b_ref[pl.ds(i, 1), :]
            o_ref[...] += y.reshape(BB, T, cout_p)    # running residual sum

        o_ref[...] = _leaky(o_ref[...])

    return kernel


def tcn_block_pallas(x_nct, params, receptive_field_size):
    N, Cin, T = x_nct.shape
    n_convs = int(np.log2(receptive_field_size)) + 1
    conv_ws, conv_bs = params["conv_w"], params["conv_b"]
    Cout = conv_ws[0].shape[0]
    has_out_conv = Cin != Cout

    cin_p, cout_p = _round_up(Cin), _round_up(Cout)

    # Activations: NCT -> NTC, channel-pad to lane width, ship as bf16 (XLA fuses
    # transpose+pad+convert into one pass).
    x_ntc = jnp.transpose(x_nct, (0, 2, 1))
    x_ntc = jnp.pad(x_ntc, ((0, 0), (0, 0), (0, cin_p - Cin))).astype(jnp.bfloat16)

    def fuse_taps(w, ic_p):
        # torch conv weight (Cout, ic, 3) -> fused (3*ic_p, cout_p) matmul weight.
        ic = w.shape[1]
        taps = [jnp.pad(w[:, :, k].T, ((0, ic_p - ic), (0, cout_p - Cout)))
                for k in range(3)]
        return jnp.concatenate(taps, axis=0).astype(jnp.bfloat16)

    w0 = fuse_taps(conv_ws[0], cin_p)                                   # (3*cin_p, cout_p)
    if n_convs > 1:
        wr = jnp.stack([fuse_taps(w, cout_p) for w in conv_ws[1:]], 0)  # (n-1, 3*cout_p, cout_p)
    else:
        wr = jnp.zeros((1, 3 * cout_p, cout_p), jnp.bfloat16)           # dummy, never read
    b = jnp.stack([jnp.pad(bi, (0, cout_p - Cout)) for bi in conv_bs], 0
                  ).astype(jnp.float32)                                 # (n_convs, cout_p)
    if has_out_conv:
        wout = jnp.pad(params["out_w"][:, :, 0].T,
                       ((0, cin_p - Cin), (0, cout_p - Cout))).astype(jnp.bfloat16)
        bout = jnp.pad(params["out_b"], (0, cout_p - Cout)).astype(jnp.float32)[None, :]
    else:
        wout = jnp.zeros((cin_p, cout_p), jnp.bfloat16)
        bout = jnp.zeros((1, cout_p), jnp.float32)

    # Batch several samples per grid step; only when T is tile-aligned so the
    # in-kernel (B, T, C) -> (B*T, C) merge is layout-free.
    BB = 1
    if T % 16 == 0:
        for cand in range(min(N, 8), 0, -1):
            if N % cand == 0:
                BB = cand
                break

    nwr = wr.shape[0]
    kernel = _make_kernel(n_convs, has_out_conv, T)
    out_ntc = pl.pallas_call(
        kernel,
        out_shape=jax.ShapeDtypeStruct((N, T, cout_p), jnp.float32),
        grid=(N // BB,),
        in_specs=[
            pl.BlockSpec((BB, T, cin_p), lambda bi: (bi, 0, 0)),
            pl.BlockSpec((3 * cin_p, cout_p), lambda bi: (0, 0)),
            pl.BlockSpec((nwr, 3 * cout_p, cout_p), lambda bi: (0, 0, 0)),
            pl.BlockSpec((n_convs, cout_p), lambda bi: (0, 0)),
            pl.BlockSpec((cin_p, cout_p), lambda bi: (0, 0)),
            pl.BlockSpec((1, cout_p), lambda bi: (0, 0)),
        ],
        out_specs=pl.BlockSpec((BB, T, cout_p), lambda bi: (bi, 0, 0)),
        compiler_params=pltpu.CompilerParams(
            dimension_semantics=("parallel",),
            vmem_limit_bytes=48 * 1024 * 1024,
        ),
    )(x_ntc, w0, wr, b, wout, bout)

    return jnp.transpose(out_ntc[:, :, :Cout], (0, 2, 1))   # back to NCT, unpadded


def tcn_block_ref(x_nct, params, receptive_field_size):
    """Pure-JAX reference mirroring the PyTorch forward (NCT layout, f32)."""
    n_convs = int(np.log2(receptive_field_size)) + 1
    Cin = x_nct.shape[1]
    Cout = params["conv_w"][0].shape[0]
    has_out_conv = Cin != Cout
    dn = ("NCH", "OIH", "NCH")
    y = x_nct
    outs = []
    for i in range(n_convs):
        if i > 0:
            y = _leaky(y)
        d = 2 ** i
        yp = jnp.pad(y, ((0, 0), (0, 0), (d, d)))
        y = jax.lax.conv_general_dilated(yp, params["conv_w"][i], (1,), "VALID",
                                         rhs_dilation=(d,), dimension_numbers=dn)
        y = y + params["conv_b"][i][None, :, None]
        outs.append(y)
    xr = x_nct
    if has_out_conv:
        xr = jax.lax.conv_general_dilated(x_nct, params["out_w"], (1,), "VALID",
                                          dimension_numbers=dn)
        xr = xr + params["out_b"][None, :, None]
    ret = xr
    for o in outs:
        ret = ret + o
    return _leaky(ret)


def _make_params(key, Cin, Cout, rf):
    n_convs = int(np.log2(rf)) + 1
    keys = jax.random.split(key, 2 * n_convs + 3)
    conv_w, conv_b = [], []
    for i in range(n_convs):
        ic = Cin if i == 0 else Cout
        conv_w.append(0.1 * jax.random.normal(keys[2 * i], (Cout, ic, 3), jnp.float32))
        conv_b.append(0.1 * jax.random.normal(keys[2 * i + 1], (Cout,), jnp.float32))
    params = {"conv_w": conv_w, "conv_b": conv_b}
    if Cin != Cout:
        params["out_w"] = 0.1 * jax.random.normal(keys[-3], (Cout, Cin, 1), jnp.float32)
        params["out_b"] = 0.1 * jax.random.normal(keys[-2], (Cout,), jnp.float32)
    return params, keys[-1]


if __name__ == "__main__":
    key = jax.random.PRNGKey(0)
    k1, k2 = jax.random.split(key)

    # Case 1: Cin != Cout (out_conv residual), rf=8 -> 4 dilated layers.
    N, Cin, Cout, T, rf = 2, 4, 8, 16, 8
    params, kx = _make_params(k1, Cin, Cout, rf)
    x = jax.random.normal(kx, (N, Cin, T), jnp.float32)
    out = jax.block_until_ready(tcn_block_pallas(x, params, rf))
    ref = tcn_block_ref(x, params, rf)
    np.testing.assert_allclose(np.asarray(out), np.asarray(ref), rtol=2e-2, atol=2e-2)

    # Case 2: Cin == Cout (identity residual), rf=1 -> single layer (empty-wr guard).
    N2, C2, T2, rf2 = 3, 8, 32, 1
    params2, kx2 = _make_params(k2, C2, C2, rf2)
    x2 = jax.random.normal(kx2, (N2, C2, T2), jnp.float32)
    out2 = jax.block_until_ready(tcn_block_pallas(x2, params2, rf2))
    ref2 = tcn_block_ref(x2, params2, rf2)
    np.testing.assert_allclose(np.asarray(out2), np.asarray(ref2), rtol=2e-2, atol=2e-2)

    print("KERNEL_OK")
</pallas_src>

<mosaic_0001>
module attributes {stable_mosaic.version = 11 : i64} {
  func.func @kernel(%arg0: i32, %arg1: memref<2x16x128xbf16, #tpu.memory_space<vmem>>, %arg2: memref<384x128xbf16, #tpu.memory_space<vmem>>, %arg3: memref<3x384x128xbf16, #tpu.memory_space<vmem>>, %arg4: memref<4x128xf32, #tpu.memory_space<vmem>>, %arg5: memref<128x128xbf16, #tpu.memory_space<vmem>>, %arg6: memref<1x128xf32, #tpu.memory_space<vmem>>, %arg7: memref<2x16x128xf32, #tpu.memory_space<vmem>>) attributes {dimension_semantics = [#tpu.dimension_semantics<parallel>], iteration_bounds = array<i64: 1>, scalar_prefetch = 0 : i64, scratch_operands = 0 : i64, tpu.core_type = #tpu.core_type<tc>, window_params = [{transform_indices = @transform_0, window_bounds = array<i64: 2, 16, 128>}, {pipeline_mode = #tpu.pipeline_mode<synchronous>, transform_indices = @transform_1, window_bounds = array<i64: 384, 128>}, {pipeline_mode = #tpu.pipeline_mode<synchronous>, transform_indices = @transform_2, window_bounds = array<i64: 3, 384, 128>}, {pipeline_mode = #tpu.pipeline_mode<synchronous>, transform_indices = @transform_3, window_bounds = array<i64: 4, 128>}, {pipeline_mode = #tpu.pipeline_mode<synchronous>, transform_indices = @transform_4, window_bounds = array<i64: 128, 128>}, {pipeline_mode = #tpu.pipeline_mode<synchronous>, transform_indices = @transform_5, window_bounds = array<i64: 1, 128>}, {transform_indices = @transform_6, window_bounds = array<i64: 2, 16, 128>}]} {
    %c0 = arith.constant 0 : index
    %c0_0 = arith.constant 0 : index
    %c0_1 = arith.constant 0 : index
    %0 = vector.load %arg1[%c0, %c0_0, %c0_1] : memref<2x16x128xbf16, #tpu.memory_space<vmem>>, vector<2x16x128xbf16>
    %1 = vector.shape_cast %0 : vector<2x16x128xbf16> to vector<32x128xbf16>
    %2 = arith.extf %1 : vector<32x128xbf16> to vector<32x128xf32>
    %3 = tpu.iota {dimensions = array<i32: 0>} : vector<32x1xi32>
    %c15_i32 = arith.constant 15 : i32
    %4 = vector.broadcast %c15_i32 : i32 to vector<32x1xi32>
    %5 = arith.andi %3, %4 : vector<32x1xi32>
    %c0_2 = arith.constant 0 : index
    %c0_3 = arith.constant 0 : index
    %6 = vector.load %arg5[%c0_2, %c0_3] : memref<128x128xbf16, #tpu.memory_space<vmem>>, vector<128x128xbf16>
    %cst = arith.constant dense<0.000000e+00> : vector<32x128xf32>
    %7 = tpu.matmul %1, %6, %cst {dimension_numbers = #tpu.dot_dimension_numbers<[1], [0], [0], [1], [0, 0, 1, 1], [], []>} : vector<32x128xbf16>, vector<128x128xbf16>, vector<32x128xf32> -> vector<32x128xf32>
    %c0_4 = arith.constant 0 : index
    %c0_5 = arith.constant 0 : index
    %8 = vector.load %arg6[%c0_4, %c0_5] : memref<1x128xf32, #tpu.memory_space<vmem>>, vector<1x128xf32>
    %9 = vector.broadcast %8 : vector<1x128xf32> to vector<32x128xf32>
    %10 = arith.addf %7, %9 : vector<32x128xf32>
    %11 = vector.shape_cast %10 : vector<32x128xf32> to vector<2x16x128xf32>
    %c0_6 = arith.constant 0 : index
    %c0_7 = arith.constant 0 : index
    %c0_8 = arith.constant 0 : index
    %12 = vector.load %arg7[%c0_6, %c0_7, %c0_8] : memref<2x16x128xf32, #tpu.memory_space<vmem>>, vector<2x16x128xf32>
    tpu.vector_store %arg7[%c0_6, %c0_7, %c0_8], %11 {strides = array<i32>} : memref<2x16x128xf32, #tpu.memory_space<vmem>>, vector<2x16x128xf32>,
    %c1_i32 = arith.constant 1 : i32
    %13 = tpu.dynamic_rotate %2 by %c1_i32 dim 0 : vector<32x128xf32>, i32 -> vector<32x128xf32>
    %c1_i32_9 = arith.constant 1 : i32
    %14 = vector.broadcast %c1_i32_9 : i32 to vector<32x1xi32>
    %15 = arith.cmpi sge, %5, %14 : vector<32x1xi32>
    %cst_10 = arith.constant 0.000000e+00 : f32
    %16 = vector.shape_cast %15 : vector<32x1xi1> to vector<32x1xi1>
    %17 = vector.broadcast %16 : vector<32x1xi1> to vector<32x128xi1>
    %18 = vector.broadcast %cst_10 : f32 to vector<32x128xf32>
    %19 = arith.select %17, %13, %18 : vector<32x128xi1>, vector<32x128xf32>
    %c31_i32 = arith.constant 31 : i32
    %20 = tpu.dynamic_rotate %2 by %c31_i32 dim 0 : vector<32x128xf32>, i32 -> vector<32x128xf32>
    %c15_i32_11 = arith.constant 15 : i32
    %21 = vector.broadcast %c15_i32_11 : i32 to vector<32x1xi32>
    %22 = arith.cmpi slt, %5, %21 : vector<32x1xi32>
    %cst_12 = arith.constant 0.000000e+00 : f32
    %23 = vector.shape_cast %22 : vector<32x1xi1> to vector<32x1xi1>
    %24 = vector.broadcast %23 : vector<32x1xi1> to vector<32x128xi1>
    %25 = vector.broadcast %cst_12 : f32 to vector<32x128xf32>
    %26 = arith.select %24, %20, %25 : vector<32x128xi1>, vector<32x128xf32>
    %27 = tpu.concatenate %19, %2, %26 in 1 : vector<32x128xf32>, vector<32x128xf32>, vector<32x128xf32> -> vector<32x384xf32>
    %c0_13 = arith.constant 0 : index
    %c0_14 = arith.constant 0 : index
    %28 = vector.load %arg2[%c0_13, %c0_14] : memref<384x128xbf16, #tpu.memory_space<vmem>>, vector<384x128xbf16>
    %29 = arith.truncf %27 : vector<32x384xf32> to vector<32x384xbf16>
    %cst_15 = arith.constant dense<0.000000e+00> : vector<32x128xf32>
    %30 = tpu.matmul %29, %28, %cst_15 {dimension_numbers = #tpu.dot_dimension_numbers<[1], [0], [0], [1], [0, 0, 1, 1], [], []>} : vector<32x384xbf16>, vector<384x128xbf16>, vector<32x128xf32> -> vector<32x128xf32>
    %c0_16 = arith.constant 0 : index
    %c0_17 = arith.constant 0 : index
    %31 = vector.load %arg4[%c0_16, %c0_17] : memref<4x128xf32, #tpu.memory_space<vmem>>, vector<1x128xf32>
    %32 = vector.broadcast %31 : vector<1x128xf32> to vector<32x128xf32>
    %33 = arith.addf %30, %32 : vector<32x128xf32>
    %c0_18 = arith.constant 0 : index
    %c0_19 = arith.constant 0 : index
    %c0_20 = arith.constant 0 : index
    %34 = vector.load %arg7[%c0_18, %c0_19, %c0_20] : memref<2x16x128xf32, #tpu.memory_space<vmem>>, vector<2x16x128xf32>
    %35 = vector.shape_cast %33 : vector<32x128xf32> to vector<2x16x128xf32>
    %36 = arith.addf %34, %35 : vector<2x16x128xf32>
    %c0_21 = arith.constant 0 : index
    %c0_22 = arith.constant 0 : index
    %c0_23 = arith.constant 0 : index
    %37 = vector.load %arg7[%c0_21, %c0_22, %c0_23] : memref<2x16x128xf32, #tpu.memory_space<vmem>>, vector<2x16x128xf32>
    tpu.vector_store %arg7[%c0_21, %c0_22, %c0_23], %36 {strides = array<i32>} : memref<2x16x128xf32, #tpu.memory_space<vmem>>, vector<2x16x128xf32>,
    %cst_24 = arith.constant 0.000000e+00 : f32
    %38 = vector.broadcast %cst_24 : f32 to vector<32x128xf32>
    %39 = arith.cmpf ogt, %33, %38 : vector<32x128xf32>
    %cst_25 = arith.constant 2.000000e-01 : f32
    %40 = vector.broadcast %cst_25 : f32 to vector<32x128xf32>
    %41 = arith.mulf %40, %33 : vector<32x128xf32>
    %42 = arith.select %39, %33, %41 : vector<32x128xi1>, vector<32x128xf32>
    %c2_i32 = arith.constant 2 : i32
    %43 = tpu.dynamic_rotate %42 by %c2_i32 dim 0 : vector<32x128xf32>, i32 -> vector<32x128xf32>
    %c2_i32_26 = arith.constant 2 : i32
    %44 = vector.broadcast %c2_i32_26 : i32 to vector<32x1xi32>
    %45 = arith.cmpi sge, %5, %44 : vector<32x1xi32>
    %cst_27 = arith.constant 0.000000e+00 : f32
    %46 = vector.shape_cast %45 : vector<32x1xi1> to vector<32x1xi1>
    %47 = vector.broadcast %46 : vector<32x1xi1> to vector<32x128xi1>
    %48 = vector.broadcast %cst_27 : f32 to vector<32x128xf32>
    %49 = arith.select %47, %43, %48 : vector<32x128xi1>, vector<32x128xf32>
    %c30_i32 = arith.constant 30 : i32
    %50 = tpu.dynamic_rotate %42 by %c30_i32 dim 0 : vector<32x128xf32>, i32 -> vector<32x128xf32>
    %c14_i32 = arith.constant 14 : i32
    %51 = vector.broadcast %c14_i32 : i32 to vector<32x1xi32>
    %52 = arith.cmpi slt, %5, %51 : vector<32x1xi32>
    %cst_28 = arith.constant 0.000000e+00 : f32
    %53 = vector.shape_cast %52 : vector<32x1xi1> to vector<32x1xi1>
    %54 = vector.broadcast %53 : vector<32x1xi1> to vector<32x128xi1>
    %55 = vector.broadcast %cst_28 : f32 to vector<32x128xf32>
    %56 = arith.select %54, %50, %55 : vector<32x128xi1>, vector<32x128xf32>
    %57 = tpu.concatenate %49, %42, %56 in 1 : vector<32x128xf32>, vector<32x128xf32>, vector<32x128xf32> -> vector<32x384xf32>
    %c0_29 = arith.constant 0 : index
    %c0_30 = arith.constant 0 : index
    %c0_31 = arith.constant 0 : index
    %58 = vector.load %arg3[%c0_29, %c0_30, %c0_31] : memref<3x384x128xbf16, #tpu.memory_space<vmem>>, vector<1x384x128xbf16>
    %59 = vector.shape_cast %58 : vector<1x384x128xbf16> to vector<384x128xbf16>
    %60 = arith.truncf %57 : vector<32x384xf32> to vector<32x384xbf16>
    %cst_32 = arith.constant dense<0.000000e+00> : vector<32x128xf32>
    %61 = tpu.matmul %60, %59, %cst_32 {dimension_numbers = #tpu.dot_dimension_numbers<[1], [0], [0], [1], [0, 0, 1, 1], [], []>} : vector<32x384xbf16>, vector<384x128xbf16>, vector<32x128xf32> -> vector<32x128xf32>
    %c1 = arith.constant 1 : index
    %c0_33 = arith.constant 0 : index
    %62 = vector.load %arg4[%c1, %c0_33] : memref<4x128xf32, #tpu.memory_space<vmem>>, vector<1x128xf32>
    %63 = vector.broadcast %62 : vector<1x128xf32> to vector<32x128xf32>
    %64 = arith.addf %61, %63 : vector<32x128xf32>
    %c0_34 = arith.constant 0 : index
    %c0_35 = arith.constant 0 : index
    %c0_36 = arith.constant 0 : index
    %65 = vector.load %arg7[%c0_34, %c0_35, %c0_36] : memref<2x16x128xf32, #tpu.memory_space<vmem>>, vector<2x16x128xf32>
    %66 = vector.shape_cast %64 : vector<32x128xf32> to vector<2x16x128xf32>
    %67 = arith.addf %65, %66 : vector<2x16x128xf32>
    %c0_37 = arith.constant 0 : index
    %c0_38 = arith.constant 0 : index
    %c0_39 = arith.constant 0 : index
    %68 = vector.load %arg7[%c0_37, %c0_38, %c0_39] : memref<2x16x128xf32, #tpu.memory_space<vmem>>, vector<2x16x128xf32>
    tpu.vector_store %arg7[%c0_37, %c0_38, %c0_39], %67 {strides = array<i32>} : memref<2x16x128xf32, #tpu.memory_space<vmem>>, vector<2x16x128xf32>,
    %cst_40 = arith.constant 0.000000e+00 : f32
    %69 = vector.broadcast %cst_40 : f32 to vector<32x128xf32>
    %70 = arith.cmpf ogt, %64, %69 : vector<32x128xf32>
    %cst_41 = arith.constant 2.000000e-01 : f32
    %71 = vector.broadcast %cst_41 : f32 to vector<32x128xf32>
    %72 = arith.mulf %71, %64 : vector<32x128xf32>
    %73 = arith.select %70, %64, %72 : vector<32x128xi1>, vector<32x128xf32>
    %c4_i32 = arith.constant 4 : i32
    %74 = tpu.dynamic_rotate %73 by %c4_i32 dim 0 : vector<32x128xf32>, i32 -> vector<32x128xf32>
    %c4_i32_42 = arith.constant 4 : i32
    %75 = vector.broadcast %c4_i32_42 : i32 to vector<32x1xi32>
    %76 = arith.cmpi sge, %5, %75 : vector<32x1xi32>
    %cst_43 = arith.constant 0.000000e+00 : f32
    %77 = vector.shape_cast %76 : vector<32x1xi1> to vector<32x1xi1>
    %78 = vector.broadcast %77 : vector<32x1xi1> to vector<32x128xi1>
    %79 = vector.broadcast %cst_43 : f32 to vector<32x128xf32>
    %80 = arith.select %78, %74, %79 : vector<32x128xi1>, vector<32x128xf32>
    %c28_i32 = arith.constant 28 : i32
    %81 = tpu.dynamic_rotate %73 by %c28_i32 dim 0 : vector<32x128xf32>, i32 -> vector<32x128xf32>
    %c12_i32 = arith.constant 12 : i32
    %82 = vector.broadcast %c12_i32 : i32 to vector<32x1xi32>
    %83 = arith.cmpi slt, %5, %82 : vector<32x1xi32>
    %cst_44 = arith.constant 0.000000e+00 : f32
    %84 = vector.shape_cast %83 : vector<32x1xi1> to vector<32x1xi1>
    %85 = vector.broadcast %84 : vector<32x1xi1> to vector<32x128xi1>
    %86 = vector.broadcast %cst_44 : f32 to vector<32x128xf32>
    %87 = arith.select %85, %81, %86 : vector<32x128xi1>, vector<32x128xf32>
    %88 = tpu.concatenate %80, %73, %87 in 1 : vector<32x128xf32>, vector<32x128xf32>, vector<32x128xf32> -> vector<32x384xf32>
    %c1_45 = arith.constant 1 : index
    %c0_46 = arith.constant 0 : index
    %c0_47 = arith.constant 0 : index
    %89 = vector.load %arg3[%c1_45, %c0_46, %c0_47] : memref<3x384x128xbf16, #tpu.memory_space<vmem>>, vector<1x384x128xbf16>
    %90 = vector.shape_cast %89 : vector<1x384x128xbf16> to vector<384x128xbf16>
    %91 = arith.truncf %88 : vector<32x384xf32> to vector<32x384xbf16>
    %cst_48 = arith.constant dense<0.000000e+00> : vector<32x128xf32>
    %92 = tpu.matmul %91, %90, %cst_48 {dimension_numbers = #tpu.dot_dimension_numbers<[1], [0], [0], [1], [0, 0, 1, 1], [], []>} : vector<32x384xbf16>, vector<384x128xbf16>, vector<32x128xf32> -> vector<32x128xf32>
    %c2 = arith.constant 2 : index
    %c0_49 = arith.constant 0 : index
    %93 = vector.load %arg4[%c2, %c0_49] : memref<4x128xf32, #tpu.memory_space<vmem>>, vector<1x128xf32>
    %94 = vector.broadcast %93 : vector<1x128xf32> to vector<32x128xf32>
    %95 = arith.addf %92, %94 : vector<32x128xf32>
    %c0_50 = arith.constant 0 : index
    %c0_51 = arith.constant 0 : index
    %c0_52 = arith.constant 0 : index
    %96 = vector.load %arg7[%c0_50, %c0_51, %c0_52] : memref<2x16x128xf32, #tpu.memory_space<vmem>>, vector<2x16x128xf32>
    %97 = vector.shape_cast %95 : vector<32x128xf32> to vector<2x16x128xf32>
    %98 = arith.addf %96, %97 : vector<2x16x128xf32>
    %c0_53 = arith.constant 0 : index
    %c0_54 = arith.constant 0 : index
    %c0_55 = arith.constant 0 : index
    %99 = vector.load %arg7[%c0_53, %c0_54, %c0_55] : memref<2x16x128xf32, #tpu.memory_space<vmem>>, vector<2x16x128xf32>
    tpu.vector_store %arg7[%c0_53, %c0_54, %c0_55], %98 {strides = array<i32>} : memref<2x16x128xf32, #tpu.memory_space<vmem>>, vector<2x16x128xf32>,
    %cst_56 = arith.constant 0.000000e+00 : f32
    %100 = vector.broadcast %cst_56 : f32 to vector<32x128xf32>
    %101 = arith.cmpf ogt, %95, %100 : vector<32x128xf32>
    %cst_57 = arith.constant 2.000000e-01 : f32
    %102 = vector.broadcast %cst_57 : f32 to vector<32x128xf32>
    %103 = arith.mulf %102, %95 : vector<32x128xf32>
    %104 = arith.select %101, %95, %103 : vector<32x128xi1>, vector<32x128xf32>
    %c8_i32 = arith.constant 8 : i32
    %105 = tpu.dynamic_rotate %104 by %c8_i32 dim 0 : vector<32x128xf32>, i32 -> vector<32x128xf32>
    %c8_i32_58 = arith.constant 8 : i32
    %106 = vector.broadcast %c8_i32_58 : i32 to vector<32x1xi32>
    %107 = arith.cmpi sge, %5, %106 : vector<32x1xi32>
    %cst_59 = arith.constant 0.000000e+00 : f32
    %108 = vector.shape_cast %107 : vector<32x1xi1> to vector<32x1xi1>
    %109 = vector.broadcast %108 : vector<32x1xi1> to vector<32x128xi1>
    %110 = vector.broadcast %cst_59 : f32 to vector<32x128xf32>
    %111 = arith.select %109, %105, %110 : vector<32x128xi1>, vector<32x128xf32>
    %c24_i32 = arith.constant 24 : i32
    %112 = tpu.dynamic_rotate %104 by %c24_i32 dim 0 : vector<32x128xf32>, i32 -> vector<32x128xf32>
    %c8_i32_60 = arith.constant 8 : i32
    %113 = vector.broadcast %c8_i32_60 : i32 to vector<32x1xi32>
    %114 = arith.cmpi slt, %5, %113 : vector<32x1xi32>
    %cst_61 = arith.constant 0.000000e+00 : f32
    %115 = vector.shape_cast %114 : vector<32x1xi1> to vector<32x1xi1>
    %116 = vector.broadcast %115 : vector<32x1xi1> to vector<32x128xi1>
    %117 = vector.broadcast %cst_61 : f32 to vector<32x128xf32>
    %118 = arith.select %116, %112, %117 : vector<32x128xi1>, vector<32x128xf32>
    %119 = tpu.concatenate %111, %104, %118 in 1 : vector<32x128xf32>, vector<32x128xf32>, vector<32x128xf32> -> vector<32x384xf32>
    %c2_62 = arith.constant 2 : index
    %c0_63 = arith.constant 0 : index
    %c0_64 = arith.constant 0 : index
    %120 = vector.load %arg3[%c2_62, %c0_63, %c0_64] : memref<3x384x128xbf16, #tpu.memory_space<vmem>>, vector<1x384x128xbf16>
    %121 = vector.shape_cast %120 : vector<1x384x128xbf16> to vector<384x128xbf16>
    %122 = arith.truncf %119 : vector<32x384xf32> to vector<32x384xbf16>
    %cst_65 = arith.constant dense<0.000000e+00> : vector<32x128xf32>
    %123 = tpu.matmul %122, %121, %cst_65 {dimension_numbers = #tpu.dot_dimension_numbers<[1], [0], [0], [1], [0, 0, 1, 1], [], []>} : vector<32x384xbf16>, vector<384x128xbf16>, vector<32x128xf32> -> vector<32x128xf32>
    %c3 = arith.constant 3 : index
    %c0_66 = arith.constant 0 : index
    %124 = vector.load %arg4[%c3, %c0_66] : memref<4x128xf32, #tpu.memory_space<vmem>>, vector<1x128xf32>
    %125 = vector.broadcast %124 : vector<1x128xf32> to vector<32x128xf32>
    %126 = arith.addf %123, %125 : vector<32x128xf32>
    %c0_67 = arith.constant 0 : index
    %c0_68 = arith.constant 0 : index
    %c0_69 = arith.constant 0 : index
    %127 = vector.load %arg7[%c0_67, %c0_68, %c0_69] : memref<2x16x128xf32, #tpu.memory_space<vmem>>, vector<2x16x128xf32>
    %128 = vector.shape_cast %126 : vector<32x128xf32> to vector<2x16x128xf32>
    %129 = arith.addf %127, %128 : vector<2x16x128xf32>
    %c0_70 = arith.constant 0 : index
    %c0_71 = arith.constant 0 : index
    %c0_72 = arith.constant 0 : index
    %130 = vector.load %arg7[%c0_70, %c0_71, %c0_72] : memref<2x16x128xf32, #tpu.memory_space<vmem>>, vector<2x16x128xf32>
    tpu.vector_store %arg7[%c0_70, %c0_71, %c0_72], %129 {strides = array<i32>} : memref<2x16x128xf32, #tpu.memory_space<vmem>>, vector<2x16x128xf32>,
    %c0_73 = arith.constant 0 : index
    %c0_74 = arith.constant 0 : index
    %c0_75 = arith.constant 0 : index
    %131 = vector.load %arg7[%c0_73, %c0_74, %c0_75] : memref<2x16x128xf32, #tpu.memory_space<vmem>>, vector<2x16x128xf32>
    %cst_76 = arith.constant 0.000000e+00 : f32
    %132 = vector.broadcast %cst_76 : f32 to vector<2x16x128xf32>
    %133 = arith.cmpf ogt, %131, %132 : vector<2x16x128xf32>
    %cst_77 = arith.constant 2.000000e-01 : f32
    %134 = vector.broadcast %cst_77 : f32 to vector<2x16x128xf32>
    %135 = arith.mulf %134, %131 : vector<2x16x128xf32>
    %136 = arith.select %133, %131, %135 : vector<2x16x128xi1>, vector<2x16x128xf32>
    %c0_78 = arith.constant 0 : index
    %c0_79 = arith.constant 0 : index
    %c0_80 = arith.constant 0 : index
    %137 = vector.load %arg7[%c0_78, %c0_79, %c0_80] : memref<2x16x128xf32, #tpu.memory_space<vmem>>, vector<2x16x128xf32>
    tpu.vector_store %arg7[%c0_78, %c0_79, %c0_80], %136 {strides = array<i32>} : memref<2x16x128xf32, #tpu.memory_space<vmem>>, vector<2x16x128xf32>,
    return
  }
  func.func @transform_0(%arg0: i32) -> (i32, i32, i32) {
    %c0_i32 = arith.constant 0 : i32
    %c0_i32_0 = arith.constant 0 : i32
    %c0_i32_1 = arith.constant 0 : i32
    return %arg0, %c0_i32, %c0_i32_0 : i32, i32, i32
  }
  func.func @transform_1(%arg0: i32) -> (i32, i32) {
    %c0_i32 = arith.constant 0 : i32
    %c0_i32_0 = arith.constant 0 : i32
    %c0_i32_1 = arith.constant 0 : i32
    return %c0_i32, %c0_i32_0 : i32, i32
  }
  func.func @transform_2(%arg0: i32) -> (i32, i32, i32) {
    %c0_i32 = arith.constant 0 : i32
    %c0_i32_0 = arith.constant 0 : i32
    %c0_i32_1 = arith.constant 0 : i32
    %c0_i32_2 = arith.constant 0 : i32
    return %c0_i32, %c0_i32_0, %c0_i32_1 : i32, i32, i32
  }
  func.func @transform_3(%arg0: i32) -> (i32, i32) {
    %c0_i32 = arith.constant 0 : i32
    %c0_i32_0 = arith.constant 0 : i32
    %c0_i32_1 = arith.constant 0 : i32
    return %c0_i32, %c0_i32_0 : i32, i32
  }
  func.func @transform_4(%arg0: i32) -> (i32, i32) {
    %c0_i32 = arith.constant 0 : i32
    %c0_i32_0 = arith.constant 0 : i32
    %c0_i32_1 = arith.constant 0 : i32
    return %c0_i32, %c0_i32_0 : i32, i32
  }
  func.func @transform_5(%arg0: i32) -> (i32, i32) {
    %c0_i32 = arith.constant 0 : i32
    %c0_i32_0 = arith.constant 0 : i32
    %c0_i32_1 = arith.constant 0 : i32
    return %c0_i32, %c0_i32_0 : i32, i32
  }
  func.func @transform_6(%arg0: i32) -> (i32, i32, i32) {
    %c0_i32 = arith.constant 0 : i32
    %c0_i32_0 = arith.constant 0 : i32
    %c0_i32_1 = arith.constant 0 : i32
    return %arg0, %c0_i32, %c0_i32_0 : i32, i32, i32
  }
}

</mosaic_0001>

<bundles_post_ra>
// kernel: tpu_custom_call.1
= control target key start
LH: loop header
LB: loop body
LE: loop exit
PB: predicated region body
PF: predicated region fallthrough
CT: control target
= control target key end

     0   :  { %11 = vsyncpa [#allocation3], 0  ;;  %s2759_s0 = inlined_call_operand.hbm [shape: bf16[2,16,128], index: 0, kind: input, shape index: {}]   ;;  %s2760_s1 = inlined_call_operand.hbm [shape: bf16[384,128], index: 1, kind: input, shape index: {}]   ;;  %s2761_s2 = inlined_call_operand.hbm [shape: bf16[3,384,128], index: 2, kind: input, shape index: {}]   ;;  %s2762_s3 = inlined_call_operand.vmem [shape: f32[4,128], index: 3, kind: input, shape index: {}]   ;;  %s2763_s4 = inlined_call_operand.hbm [shape: bf16[128,128], index: 4, kind: input, shape index: {}]   ;;  %s2764_s5 = inlined_call_operand.vmem [shape: f32[1,128], index: 5, kind: input, shape index: {}]   ;;  %s2765_s6 = inlined_call_operand.hbm [shape: f32[2,16,128], index: 6, kind: output, shape index: {}]  }
   0x1   :  { %12 = vsyncpa [#allocation6], 0 }
   0x2   :  { %13 = vsyncpa [#allocation9], 0 }
   0x3   :  { %14 = vsyncpa [#allocation4], 0  ;;  %s2447_s21 = smov [#allocation5]   ;;  %s2448_s23 = smov [#allocation2]  }
   0x4   :  { %s32_s22 = sshll.u32 %s2447_s21, 4  ;;  %s20_s24 = sshll.u32 %s2448_s23, 4  ;;  %s33_s22 = int_to_ptr.vmem [resolvable:$true] %s32_s22  ;;  %s2493_s24 = int_to_ptr.vmem [resolvable:$true] %s20_s24 }
   0x5   :  { %s2329_s27 = scalar_lea.hbm %s2760_s1, 3072 }
   0x6   :  { %p2330_p0 = scmp.ne.s32.totalorder %s2760_s1, %s2329_s27  ;;  %p2333_p1 = scmp.lt.u32.totalorder %s2329_s27, %s2760_s1 }
   0x8   :  { %p2335_p2 = pnand %p2333_p1, %p2330_p0 }
   0xa   :  { %2338 = shalt.err (!%p2335_p2)
}
   0xb   :  { %s2339_s8 = scalar_lea.vmem %s33_s22, 3072  ;;  %p2344_p4 = scmp.lt.s32.totalorder %s33_s22, %s33_s22 }
   0xc   :  { %p2340_p3 = scmp.ne.s32.totalorder %s33_s22, %s2339_s8  ;;  %p2345_p5 = scmp.lt.s32.totalorder %s2339_s8, %s2339_s8 }
   0xe   :  { %p2346_p6 = por %p2345_p5, %p2344_p4 }
  0x10   :  { %p2347_p7 = pnand %p2346_p6, %p2340_p3 }
  0x12   :  { %2350 = shalt.err (!%p2347_p7)
}
  0x13   :  { %s2449_s9 = smov 64   ;;  %s2450_s10 = smov 4  }
  0x14   :  { %38 = dma.hbm_to_vmem [thread:$0]  %s2760_s1, 3072, %s33_s22, [#allocation6], %s2449_s9, %s2449_s9, %s2450_s10  }
  0x15   :  { %s2351_s15 = scalar_lea.hbm %s2759_s0, 256 }
  0x16   :  { %p2352_p8 = scmp.ne.s32.totalorder %s2759_s0, %s2351_s15  ;;  %p2355_p9 = scmp.lt.u32.totalorder %s2351_s15, %s2759_s0 }
  0x18   :  { %p2357_p10 = pnand %p2355_p9, %p2352_p8 }
  0x1a   :  { %2360 = shalt.err (!%p2357_p10)
}
  0x1b   :  { %s2361_s20 = scalar_lea.vmem %s2493_s24, 256  ;;  %p2366_p12 = scmp.lt.s32.totalorder %s2493_s24, %s2493_s24 }
  0x1c   :  { %p2362_p11 = scmp.ne.s32.totalorder %s2493_s24, %s2361_s20  ;;  %p2367_p13 = scmp.lt.s32.totalorder %s2361_s20, %s2361_s20 }
  0x1e   :  { %p2368_p0 = por %p2367_p13, %p2366_p12 }
  0x20   :  { %p2369_p1 = pnand %p2368_p0, %p2362_p11 }
  0x22   :  { %2372 = shalt.err (!%p2369_p1)
}
  0x23   :  { %26 = dma.hbm_to_vmem [thread:$0]  %s2759_s0, 256, %s2493_s24, [#allocation3], %s2449_s9, %s2449_s9, %s2450_s10  }
  0x24   :  { %s2451_s22 = smov [#allocation7]   ;;  %s2452_s25 = smov [#allocation8]  }
  0x25   :  { %s44_s23 = sshll.u32 %s2451_s22, 4  ;;  %s58_s26 = sshll.u32 %s2452_s25, 4  ;;  %s45_s23 = int_to_ptr.vmem [resolvable:$true] %s44_s23  ;;  %s2530_s26 = int_to_ptr.vmem [resolvable:$true] %s58_s26 }
  0x26   :  { %s2373_s29 = scalar_lea.hbm %s2761_s2, 9216 }
  0x27   :  { %p2374_p2 = scmp.ne.s32.totalorder %s2761_s2, %s2373_s29  ;;  %p2377_p3 = scmp.lt.u32.totalorder %s2373_s29, %s2761_s2 }
  0x29   :  { %p2379_p4 = pnand %p2377_p3, %p2374_p2 }
  0x2b   :  { %2382 = shalt.err (!%p2379_p4)
}
  0x2c   :  { %s2383_s0 = scalar_lea.vmem %s45_s23, 9216  ;;  %p2388_p6 = scmp.lt.s32.totalorder %s45_s23, %s45_s23 }
  0x2d   :  { %p2384_p5 = scmp.ne.s32.totalorder %s45_s23, %s2383_s0  ;;  %p2389_p7 = scmp.lt.s32.totalorder %s2383_s0, %s2383_s0 }
  0x2f   :  { %p2390_p8 = por %p2389_p7, %p2388_p6 }
  0x31   :  { %p2391_p9 = pnand %p2390_p8, %p2384_p5 }
  0x33   :  { %2394 = shalt.err (!%p2391_p9)
}
  0x34   :  { %50 = dma.hbm_to_vmem [thread:$0]  %s2761_s2, 9216, %s45_s23, [#allocation6], %s2449_s9, %s2449_s9, %s2450_s10  }
  0x35   :  { %s2395_s15 = scalar_lea.hbm %s2763_s4, 1024 }
  0x36   :  { %p2396_p10 = scmp.ne.s32.totalorder %s2763_s4, %s2395_s15  ;;  %p2399_p11 = scmp.lt.u32.totalorder %s2395_s15, %s2763_s4 }
  0x38   :  { %p2401_p12 = pnand %p2399_p11, %p2396_p10 }
  0x3a   :  { %2404 = shalt.err (!%p2401_p12)
}
  0x3b   :  { %s2405_s20 = scalar_lea.vmem %s2530_s26, 1024  ;;  %p2410_p0 = scmp.lt.s32.totalorder %s2530_s26, %s2530_s26 }
  0x3c   :  { %p2406_p13 = scmp.ne.s32.totalorder %s2530_s26, %s2405_s20  ;;  %p2411_p1 = scmp.lt.s32.totalorder %s2405_s20, %s2405_s20 }
  0x3e   :  { %p2412_p2 = por %p2411_p1, %p2410_p0 }
  0x40   :  { %p2413_p3 = pnand %p2412_p2, %p2406_p13 }
  0x42   :  { %2416 = shalt.err (!%p2413_p3)
}
  0x43   :  { %64 = dma.hbm_to_vmem [thread:$0]  %s2763_s4, 1024, %s2530_s26, [#allocation9], %s2449_s9, %s2449_s9, %s2450_s10  }
  0x44   :  { %2439 = dma.done.wait [#allocation3], 256  }
  0x45   :  { %2440 = vsyncadd [#allocation3], 4294967040 }
  0x46   :  { %2441 = dma.done.wait [#allocation6], 12288  }
  0x47   :  { %2442 = vsyncadd [#allocation6], 4294955008 }
  0x48   :  { %2443 = dma.done.wait [#allocation9], 1024  }
  0x49   :  { %2444 = vsyncadd [#allocation9], 4294966272  ;;  %v2221_v0 = vld [vmem:[#allocation8] sm:$0xff]   ;;  %v2222_v1 = vld [vmem:[#allocation8 + $0x8] sm:$0xff]   ;;  %v88_v11 = vlaneseq  ;;  %vm2453_vm5 = vmmov 1  }
  0x4a   :  { %2046 = vmatprep.subr.bf16.mxu0 %v2221_v0  ;;  %v2223_v2 = vld [vmem:[#allocation8 + $0x10] sm:$0xff]   ;;  %v2226_v3 = vld [vmem:[#allocation5 + $0x40] sm:$0xff]   ;;  %v2224_v5 = vld [vmem:[#allocation8 + $0x18] sm:$0xff]  }
  0x4b   :  { %2047 = vmatpush3.bf16.msra.mxu0 %v2221_v0  ;;  %v2227_v4 = vld [vmem:[#allocation5] sm:$0xff]   ;;  %1894 = vmatprep.subr.bf16.mxu1 %v2226_v3  ;;  %v2229_v6 = vld [vmem:[#allocation5 + $0x48] sm:$0xff]   ;;  %v2232_v9 = vld [vmem:[#allocation5 + $0x50] sm:$0xff]   ;;  %v2567_v16 = vshrl.u32 %v88_v11, 7 }
  0x4c   :  { %2048 = vmatprep.subr.bf16.mxu0 %v2222_v1  ;;  %1895 = vmatpush3.bf16.msra.mxu1 %v2227_v4  ;;  %v2230_v7 = vld [vmem:[#allocation5 + $0x8] sm:$0xff]   ;;  %v2225_v8 = vld [vmem:[#allocation8 + $0x20] sm:$0xff]   ;;  %v2233_v10 = vld [vmem:[#allocation5 + $0x10] sm:$0xff]  }
  0x4d   :  { %1896 = vmatprep.subr.bf16.mxu1 %v2229_v6  ;;  %v2228_v12 = vld [vmem:[#allocation8 + $0x28] sm:$0xff]   ;;  %v2235_v13 = vld [vmem:[#allocation5 + $0x58] sm:$0xff]   ;;  %v80_v15 = vld [vmem:[#allocation2] sm:$0xff]   ;;  %vm262_vm0 = vcmp.lt.s32.totalorder %v2567_v16, 7  ;;  %v2573_v21 = vand.u32 15, %v2567_v16  ;;  %vm237_vm1 = vcmp.lt.s32.totalorder %v2567_v16, 1 }
  0x4e   :  { %v2236_v14 = vld [vmem:[#allocation5 + $0x18] sm:$0xff]   ;;  %v2240_v17 = vld [vmem:[#allocation5 + $0x60] sm:$0xff]   ;;  %2062 = vmatprep.mubr.bf16.mxu0 %v80_v15  ;;  %v2231_v18 = vld [vmem:[#allocation8 + $0x30] sm:$0xff]   ;;  %v84_v22 = vunpack.c.l.bf16 %v80_v15  ;;  %v85_v23 = vunpack.c.h.bf16 %v80_v15  ;;  %518 = vmatprep.mubr.bf16.mxu1 %v80_v15  ;;  %v90_v27 = vadd.s32 8, %v2567_v16  ;;  %v91_v34 = vadd.s32 16, %v2567_v16 }
  0x4f   :  { %2049 = vmatpush3.bf16.msra.mxu0 %v2222_v1  ;;  %v2569_v19 = vld [vmem:[#allocation2 + $0x8] sm:$0xff]   ;;  %v2241_v20 = vld [vmem:[#allocation5 + $0x20] sm:$0xff]   ;;  %v2243_v26 = vld [vmem:[#allocation5 + $0x68] sm:$0xff]   ;;  %v92_v45 = vadd.s32 24, %v2567_v16  ;;  %vm242_vm3 = vcmp.ge.s32.totalorder %v2573_v21, 1  ;;  %vm612_vm12 = vcmp.lt.s32.totalorder %v2567_v16, 2 }
  0x50   :  { %2050 = vmatprep.subr.bf16.mxu0 %v2223_v2  ;;  %1897 = vmatpush3.bf16.msra.mxu1 %v2230_v7  ;;  %v2234_v24 = vld [vmem:[#allocation8 + $0x38] sm:$0xff]   ;;  %v86_v25 = vunpack.c.l.bf16 %v2569_v19  ;;  %v2578_v28 = vrot.slane %v84_v22, 1  ;;  %v259_v29 = vrot.slane %v85_v23, 1  ;;  %v87_v30 = vunpack.c.h.bf16 %v2569_v19  ;;  %v2244_v32 = vld [vmem:[#allocation5 + $0x28] sm:$0xff]   ;;  %v2246_v33 = vld [vmem:[#allocation5 + $0x70] sm:$0xff]  }
  0x51   :  { %1898 = vmatprep.subr.bf16.mxu1 %v2232_v9  ;;  %v2238_v35 = vld [vmem:[#allocation5 + $0x80] sm:$0xff]   ;;  %v2584_v36 = vand.u32 15, %v90_v27  ;;  %v233_v37 = vrot.slane %v84_v22, 7  ;;  %v234_v38 = vrot.slane %v85_v23, 7  ;;  %v2247_v40 = vld [vmem:[#allocation5 + $0x30] sm:$0xff]   ;;  %v2249_v43 = vld [vmem:[#allocation5 + $0x78] sm:$0xff]  }
  0x52   :  { %v2581_v31 = vrot.slane %v86_v25, 1  ;;  %v236_v39 = vrot.slane %v87_v30, 7  ;;  %v265_v42 = vsel %vm262_vm0, %v2578_v28, %v259_v29  ;;  %v2592_v44 = vand.u32 15, %v91_v34  ;;  %v2242_v46 = vld [vmem:[#allocation5 + $0x88] sm:$0xff]   ;;  %v2250_v48 = vld [vmem:[#allocation5 + $0x38] sm:$0xff]   ;;  %vm2605_vm7 = vmpackc.low %vm2453_vm5, %vm242_vm3 }
  0x53   :  { %2051 = vmatpush3.bf16.msra.mxu0 %v2223_v2  ;;  %vm268_vm2 = vcmp.lt.s32.totalorder %v2584_v36, 15  ;;  %v240_v49 = vsel %vm237_vm1, %v233_v37, %v234_v38  ;;  %v2609_v53 = vand.u32 15, %v92_v45  ;;  %v2255_v54 = vld [vmem:[#allocation7 + $0x40] sm:$0xff]   ;;  %v235_v55 = vrot.slane %v86_v25, 7  ;;  %v2245_v56 = vld [vmem:[#allocation5 + $0x90] sm:$0xff]   ;;  %v2248_v60 = vld [vmem:[#allocation5 + $0x98] sm:$0xff]  }
  0x54   :  { %2052 = vmatprep.subr.bf16.mxu0 %v2224_v5  ;;  %1899 = vmatpush3.bf16.msra.mxu1 %v2233_v10  ;;  %v264_v41 = vsel %vm262_vm0, %v259_v29, %v2581_v31  ;;  %v241_v50 = vsel %vm237_vm1, %v236_v39, %v233_v37  ;;  %vm244_vm4 = vcmp.ge.s32.totalorder %v2592_v44, 1  ;;  %vm1779_vm6 = vmpackc.low %vm268_vm2, %vm2453_vm5  ;;  %v261_v58 = vrot.slane %v87_v30, 1  ;;  %v2256_v59 = vld [vmem:[#allocation7] sm:$0xff]   ;;  %v2252_v1 = vld [vmem:[#allocation5 + $0xa8] sm:$0xff]  }
  0x55   :  { %1900 = vmatprep.subr.bf16.mxu1 %v2235_v13  ;;  %v1780_v47 = vpack.c.bf16 %v264_v41, %v265_v42  ;;  %v1774_v52 = vpack.c.bf16 %v240_v49, %v241_v50  ;;  %vm2612_vm8 = vmpackc.low %vm2453_vm5, %vm244_vm4  ;;  %v238_v61 = vsel %vm237_vm1, %v235_v55, %v236_v39  ;;  %v239_v62 = vsel %vm237_vm1, %v234_v38, %v235_v55  ;;  %v2251_v63 = vld [vmem:[#allocation5 + $0xa0] sm:$0xff]   ;;  %v2253_v2 = vld [vmem:[#allocation5 + $0xb0] sm:$0xff]  }
  0x56   :  { %v1777_v0 = vpack.c.bf16 %v238_v61, %v239_v62  ;;  %vm270_vm9 = vcmp.lt.s32.totalorder %v2609_v53, 15  ;;  %v2254_v3 = vld [vmem:[#allocation5 + $0xb8] sm:$0xff]   ;;  %v2257_v4 = vld [vmem:[#allocation7 + $0x80] sm:$0xff]   ;;  %v266_v6 = vsel %vm262_vm0, %v261_v58, %v2578_v28  ;;  %v2259_v9 = vld [vmem:[#allocation7 + $0x8] sm:$0xff]   ;;  %vm637_vm14 = vcmp.lt.s32.totalorder %v2567_v16, 6 }
  0x57   :  { %2053 = vmatpush3.bf16.msra.mxu0 %v2224_v5  ;;  %vm1782_vm10 = vmpackc.low %vm270_vm9, %vm2453_vm5  ;;  %v263_v5 = vsel %vm262_vm0, %v2581_v31, %v261_v58  ;;  %v2260_v10 = vld [vmem:[#allocation7 + $0x88] sm:$0xff]   ;;  %v2261_v11 = vld [vmem:[#allocation7 + $0x50] sm:$0xff]   ;;  %vm617_vm0 = vcmp.ge.s32.totalorder %v2573_v21, 2  ;;  %vm643_vm1 = vcmp.lt.s32.totalorder %v2584_v36, 14  ;;  %vm645_vm2 = vcmp.lt.s32.totalorder %v2609_v53, 14 }
  0x58   :  { %2054 = vmatprep.subr.bf16.mxu0 %v2225_v8  ;;  %1901 = vmatpush3.bf16.msra.mxu1 %v2236_v14  ;;  %v1783_v7 = vpack.c.bf16 %v266_v6, %v263_v5  ;;  %v2262_v13 = vld [vmem:[#allocation7 + $0x10] sm:$0xff]   ;;  %v2264_v14 = vld [vmem:[#allocation7 + $0x58] sm:$0xff]   ;;  %v2270_v22 = vld [vmem:[#allocation7 + $0x68] sm:$0xff]  }
  0x59   :  { %1902 = vmatprep.subr.bf16.mxu1 %v2240_v17  ;;  %v2265_v15 = vld [vmem:[#allocation7 + $0x18] sm:$0xff]   ;;  %v2271_v23 = vld [vmem:[#allocation7 + $0x28] sm:$0xff]   ;;  %v2273_v25 = vld [vmem:[#allocation7 + $0x70] sm:$0xff]  }
  0x5a   :  { %v2266_v17 = vld [vmem:[#allocation7 + $0x98] sm:$0xff]   ;;  %v2275_v27 = vld [vmem:[#allocation7 + $0xb0] sm:$0xff]   ;;  %v2279_v31 = vld [vmem:[#allocation7 + $0x100] sm:$0xff]  }
  0x5b   :  { %2055 = vmatpush3.bf16.msra.mxu0 %v2225_v8  ;;  %v2258_v8 = vld [vmem:[#allocation7 + $0x48] sm:$0xff]   ;;  %v2276_v28 = vld [vmem:[#allocation7 + $0x78] sm:$0xff]   ;;  %vm2669_vm4 = vmpackc.low %vm2453_vm5, %vm617_vm0  ;;  %vm992_vm0 = vcmp.ge.s32.totalorder %v2573_v21, 4 }
  0x5c   :  { %2056 = vmatprep.subr.bf16.mxu0 %v2228_v12  ;;  %1903 = vmatpush3.bf16.msra.mxu1 %v2241_v20  ;;  %v2268_v20 = vld [vmem:[#allocation7 + $0x20] sm:$0xff]   ;;  %v2277_v29 = vld [vmem:[#allocation7 + $0x38] sm:$0xff]  }
  0x5d   :  { %1904 = vmatprep.subr.bf16.mxu1 %v2243_v26  ;;  %v2274_v26 = vld [vmem:[#allocation7 + $0x30] sm:$0xff]   ;;  %v2278_v30 = vld [vmem:[#allocation7 + $0xb8] sm:$0xff]   ;;  %v2304_v21 = vld [vmem:[#allocation7 + $0x180] sm:$0xff]  }
  0x5f   :  { %2057 = vmatpush3.bf16.msra.mxu0 %v2228_v12  ;;  %v2263_v12 = vld [vmem:[#allocation7 + $0x90] sm:$0xff]  }
  0x60   :  { %2058 = vmatprep.subr.bf16.mxu0 %v2231_v18  ;;  %1905 = vmatpush3.bf16.msra.mxu1 %v2244_v32  ;;  %v2633_v32 = vld [vmem:[#allocation7 + $0x140] sm:$0xff]  }
  0x61   :  { %1906 = vmatprep.subr.bf16.mxu1 %v2246_v33 }
  0x63   :  { %2059 = vmatpush3.bf16.msra.mxu0 %v2231_v18  ;;  %v2267_v18 = vld [vmem:[#allocation7 + $0x60] sm:$0xff]  }
  0x64   :  { %2060 = vmatprep.subr.bf16.mxu0 %v2234_v24  ;;  %1907 = vmatpush3.bf16.msra.mxu1 %v2247_v40 }
  0x65   :  { %1908 = vmatprep.subr.bf16.mxu1 %v2249_v43 }
  0x67   :  { %2061 = vmatpush3.bf16.msra.mxu0 %v2234_v24  ;;  %v2272_v24 = vld [vmem:[#allocation7 + $0xa8] sm:$0xff]  }
  0x68   :  { %2066 = vmatprep.subr.bf16.mxu0 %v2238_v35  ;;  %1909 = vmatpush3.bf16.msra.mxu1 %v2250_v48 }
  0x69   :  { %1932 = vmatprep.subr.bf16.mxu1 %v2255_v54 }
  0x6a   :  { %2063 = vmatmul.mubr.bf16.vlgmr.msra.gmra.mrb[0].mxu0 %v2569_v19 }
  0x6b   :  { %2067 = vmatpush3.bf16.msra.mxu0 %v2238_v35  ;;  %2082 = vmatprep.mubr.msk.bf16.mxu0 %vm1779_vm6, %v1780_v47  ;;  %v1748_v47 = vld [vmem:[%s2762_s3] ss:$0 sm:$0xff]  ;;  %vm1816_vm6 = vmpackc.low %vm643_vm1, %vm2453_vm5  ;;  %vm1011_vm1 = vcmp.lt.s32.totalorder %v2609_v53, 12 }
  0x6c   :  { %2068 = vmatprep.subr.bf16.mxu0 %v2242_v46  ;;  %1775 = vmatmul.mubr.msk.bf16.vlgmr.msra.gmra.mrb[0].mxu1 %vm2605_vm7, %v1774_v52  ;;  %vm1819_vm7 = vmpackc.low %vm645_vm2, %vm2453_vm5 }
  0x6d   :  { %526 = vmatprep.mubr.bf16.mxu1 %v2569_v19  ;;  %1933 = vmatpush3.bf16.msra.mxu1 %v2256_v59  ;;  %v2269_v19 = vld [vmem:[#allocation7 + $0xa0] sm:$0xff]  }
  0x6e   :  { %1934 = vmatprep.subr.bf16.mxu1 %v2258_v8 }
  0x6f   :  { %2069 = vmatpush3.bf16.msra.mxu0 %v2242_v46 }
  0x70   :  { %2070 = vmatprep.subr.bf16.mxu0 %v2245_v56 }
  0x71   :  { %1935 = vmatpush3.bf16.msra.mxu1 %v2259_v9 }
  0x72   :  { %1936 = vmatprep.subr.bf16.mxu1 %v2261_v11 }
  0x73   :  { %2071 = vmatpush3.bf16.msra.mxu0 %v2245_v56 }
  0x74   :  { %2072 = vmatprep.subr.bf16.mxu0 %v2248_v60  ;;  %1778 = vmatmul.mubr.msk.bf16.gmra.mrb[4].mxu1 %vm2612_vm8, %v1777_v0  ;;  %vm619_vm8 = vcmp.ge.s32.totalorder %v2592_v44, 2 }
  0x75   :  { %1937 = vmatpush3.bf16.msra.mxu1 %v2262_v13  ;;  %vm1813_vm9 = vmpackc.low %vm2453_vm5, %vm619_vm8 }
  0x76   :  { %1938 = vmatprep.subr.bf16.mxu1 %v2264_v14 }
  0x77   :  { %2073 = vmatpush3.bf16.msra.mxu0 %v2248_v60 }
  0x78   :  { %2074 = vmatprep.subr.bf16.mxu0 %v2251_v63 }
  0x79   :  { %1939 = vmatpush3.bf16.msra.mxu1 %v2265_v15 }
  0x7a   :  { %1940 = vmatprep.subr.bf16.mxu1 %v2267_v18 }
  0x7b   :  { %2075 = vmatpush3.bf16.msra.mxu0 %v2251_v63 }
  0x7c   :  { %2076 = vmatprep.subr.bf16.mxu0 %v2252_v1 }
  0x7d   :  { %1941 = vmatpush3.bf16.msra.mxu1 %v2268_v20 }
  0x7e   :  { %1942 = vmatprep.subr.bf16.mxu1 %v2270_v22 }
  0x7f   :  { %2077 = vmatpush3.bf16.msra.mxu0 %v2252_v1 }
  0x80   :  { %2078 = vmatprep.subr.bf16.mxu0 %v2253_v2 }
  0x81   :  { %1943 = vmatpush3.bf16.msra.mxu1 %v2271_v23 }
  0x82   :  { %1944 = vmatprep.subr.bf16.mxu1 %v2273_v25 }
  0x83   :  { %2079 = vmatpush3.bf16.msra.mxu0 %v2253_v2 }
  0x84   :  { %2080 = vmatprep.subr.bf16.mxu0 %v2254_v3 }
  0x85   :  { %1945 = vmatpush3.bf16.msra.mxu1 %v2274_v26 }
  0x86   :  { %1946 = vmatprep.subr.bf16.mxu1 %v2276_v28 }
  0x87   :  { %2081 = vmatpush3.bf16.msra.mxu0 %v2254_v3 }
  0x88   :  { %2086 = vmatprep.subr.bf16.mxu0 %v2257_v4 }
  0x89   :  { %1947 = vmatpush3.bf16.msra.mxu1 %v2277_v29  ;;  %v2281_v29 = vld [vmem:[#allocation7 + $0xc0] sm:$0xff]  }
  0x8a   :  { %2083 = vmatmul.mubr.msk.bf16.vlgmr.msra.gmra.mrb[4].mxu0 %vm1782_vm10, %v1783_v7  ;;  %1970 = vmatprep.subr.bf16.mxu1 %v2279_v31  ;;  %v2282_v31 = vld [vmem:[#allocation7 + $0x108] sm:$0xff]  }
  0x8b   :  { %2087 = vmatpush3.bf16.msra.mxu0 %v2257_v4 }
  0x8c   :  { %2088 = vmatprep.subr.bf16.mxu0 %v2260_v10 }
  0x8f   :  { %2089 = vmatpush3.bf16.msra.mxu0 %v2260_v10 }
  0x90   :  { %2090 = vmatprep.subr.bf16.mxu0 %v2263_v12 }
  0x93   :  { %2091 = vmatpush3.bf16.msra.mxu0 %v2263_v12 }
  0x94   :  { %2092 = vmatprep.subr.bf16.mxu0 %v2266_v17 }
  0x97   :  { %2093 = vmatpush3.bf16.msra.mxu0 %v2266_v17 }
  0x98   :  { %2094 = vmatprep.subr.bf16.mxu0 %v2269_v19 }
  0x9b   :  { %2095 = vmatpush3.bf16.msra.mxu0 %v2269_v19 }
  0x9c   :  { %2096 = vmatprep.subr.bf16.mxu0 %v2272_v24 }
  0x9f   :  { %2097 = vmatpush3.bf16.msra.mxu0 %v2272_v24 }
  0xa0   :  { %2098 = vmatprep.subr.bf16.mxu0 %v2275_v27 }
  0xa3   :  { %2099 = vmatpush3.bf16.msra.mxu0 %v2275_v27 }
  0xa4   :  { %2100 = vmatprep.subr.bf16.mxu0 %v2278_v30 }
  0xa7   :  { %2101 = vmatpush3.bf16.msra.mxu0 %v2278_v30 }
  0xa8   :  { %2106 = vmatprep.subr.bf16.mxu0 %v2633_v32 }
 0x13f   :  { %v1910_v33 = vpop.f32.mrb[0].mxu1 }
 0x140   :  { %v1911_v34 = vpop.f32.mrb[1].mxu1 }
 0x141   :  { %v1912_v35 = vadd.f32 %v1911_v34, %v1910_v33  ;;  %v1913_v37 = vpop.f32.mrb[2].mxu1  ;;  %v2283_v33 = vld [vmem:[#allocation7 + $0x148] sm:$0xff]  }
 0x142   :  { %v1914_v38 = vpop.f32.mrb[3].mxu1  ;;  %v2284_v34 = vld [vmem:[#allocation7 + $0xc8] sm:$0xff]  }
 0x143   :  { %v1915_v39 = vadd.f32 %v1914_v38, %v1913_v37  ;;  %v521_v50 = vadd.f32 %v1912_v35, %v1748_v47  ;;  %v2285_v35 = vld [vmem:[#allocation7 + $0x110] sm:$0xff]  }
 0x144   :  { %v2286_v37 = vld [vmem:[#allocation7 + $0x150] sm:$0xff]  }
 0x145   :  { %v524_v57 = vadd.f32 %v1915_v39, %v1748_v47  ;;  %v2287_v38 = vld [vmem:[#allocation7 + $0xd0] sm:$0xff]   ;;  %v2288_v39 = vld [vmem:[#allocation7 + $0x118] sm:$0xff]  }
 0x147   :  { %v1916_v40 = vpop.f32.mrb[4].mxu1 }
 0x148   :  { %v1917_v41 = vpop.f32.mrb[5].mxu1 }
 0x149   :  { %v1918_v42 = vadd.f32 %v1917_v41, %v1916_v40  ;;  %v1919_v43 = vpop.f32.mrb[6].mxu1  ;;  %v2289_v40 = vld [vmem:[#allocation7 + $0x158] sm:$0xff]  }
 0x14a   :  { %v1920_v45 = vpop.f32.mrb[7].mxu1  ;;  %v2290_v41 = vld [vmem:[#allocation7 + $0xd8] sm:$0xff]  }
 0x14b   :  { %v1921_v46 = vadd.f32 %v1920_v45, %v1919_v43  ;;  %v529_v48 = vadd.f32 %v1918_v42, %v1748_v47  ;;  %v2292_v42 = vld [vmem:[#allocation7 + $0x160] sm:$0xff]   ;;  %v2294_v45 = vld [vmem:[#allocation7 + $0x128] sm:$0xff]  }
 0x14c   :  { %v2293_v43 = vld [vmem:[#allocation7 + $0xe0] sm:$0xff]  }
 0x14d   :  { %v532_v54 = vadd.f32 %v1921_v46, %v1748_v47  ;;  %v2295_v46 = vld [vmem:[#allocation7 + $0x168] sm:$0xff]  }
 0x14e   :  { %v2296_v47 = vld [vmem:[#allocation7 + $0xe8] sm:$0xff]  }
 0x15d   :  { %v2084_v49 = vpop.f32.mrb[4].mxu0 }
 0x15e   :  { %v2639_v51 = vadd.f32 %v2084_v49, %v529_v48  ;;  %v569_v52 = vpop.f32.mrb[5].mxu0  ;;  %v2297_v48 = vld [vmem:[#allocation7 + $0x130] sm:$0xff]  }
 0x15f   :  { %v2641_v55 = vadd.f32 %v569_v52, %v521_v50  ;;  %v2085_v56 = vpop.f32.mrb[6].mxu0  ;;  %v2298_v49 = vld [vmem:[#allocation7 + $0x170] sm:$0xff]   ;;  %v2300_v52 = vld [vmem:[#allocation7 + $0x138] sm:$0xff]  }
 0x160   :  { %vm598_vm11 = vcmp.gt.f32.partialorder %v2639_v51, 0.0  ;;  %v602_v58 = vmul.f32 0.2, %v2639_v51  ;;  %v2645_v59 = vadd.f32 %v2085_v56, %v532_v54  ;;  %v572_v60 = vpop.f32.mrb[7].mxu0  ;;  %v2299_v50 = vld [vmem:[#allocation7 + $0xf0] sm:$0xff]   ;;  %v2301_v54 = vld [vmem:[#allocation7 + $0x178] sm:$0xff]  }
 0x161   :  { %v600_v61 = vmul.f32 0.2, %v2641_v55  ;;  %v2649_v62 = vadd.f32 %v572_v60, %v524_v57  ;;  %vm596_vm13 = vcmp.gt.f32.partialorder %v2641_v55, 0.0  ;;  %v2302_v56 = vld [vmem:[#allocation7 + $0xf8] sm:$0xff]   ;;  %v2303_v57 = vld [vmem:[#allocation7 + $0x1c0] sm:$0xff]  }
 0x162   :  { %v606_v63 = vsel %vm598_vm11, %v2639_v51, %v602_v58  ;;  %vm599_vm15 = vcmp.gt.f32.partialorder %v2645_v59, 0.0  ;;  %v603_v0 = vmul.f32 0.2, %v2645_v59  ;;  %v2698_v58 = vld [vmem:[#allocation7 + $0x200] sm:$0xff]  }
 0x163   :  { %v610_v1 = vrot.slane %v606_v63, 6  ;;  %v601_v2 = vmul.f32 0.2, %v2649_v62  ;;  %v635_v3 = vrot.slane %v606_v63, 2  ;;  %vm597_vm3 = vcmp.gt.f32.partialorder %v2649_v62, 0.0 }
 0x164   :  { %v607_v4 = vsel %vm599_vm15, %v2645_v59, %v603_v0  ;;  %v604_v5 = vsel %vm596_vm13, %v2641_v55, %v600_v61  ;;  %v1785_v0 = vld [vmem:[%s2762_s3 + $0x1] ss:$0 sm:$0xff] }
 0x165   :  { %v611_v6 = vrot.slane %v607_v4, 6  ;;  %v636_v7 = vrot.slane %v607_v4, 2  ;;  %v605_v8 = vsel %vm597_vm3, %v2649_v62, %v601_v2  ;;  %v608_v9 = vrot.slane %v604_v5, 6  ;;  %vm1847_vm3 = vmpackc.low %vm2453_vm5, %vm992_vm0 }
 0x166   :  { %v609_v10 = vrot.slane %v605_v8, 6  ;;  %v633_v11 = vrot.slane %v604_v5, 2  ;;  %v634_v12 = vrot.slane %v605_v8, 2  ;;  %v707_v13 = vpack.c.bf16 %v605_v8, %v604_v5 }
 0x167   :  { %v616_v14 = vsel %vm612_vm12, %v611_v6, %v608_v9  ;;  %v710_v17 = vpack.c.bf16 %v607_v4, %v606_v63  ;;  %v638_v18 = vsel %vm637_vm14, %v635_v3, %v636_v7  ;;  %v613_v19 = vsel %vm612_vm12, %v610_v1, %v611_v6  ;;  %v1735_v4 = vld [vmem:[%s2764_s5] ss:$0 sm:$0xff] }
 0x168   :  { %v615_v20 = vsel %vm612_vm12, %v608_v9, %v609_v10  ;;  %893 = vmatprep.mubr.bf16.mxu1 %v707_v13  ;;  %v639_v22 = vsel %vm637_vm14, %v634_v12, %v635_v3  ;;  %v640_v23 = vsel %vm637_vm14, %v633_v11, %v634_v12  ;;  %v641_v24 = vsel %vm637_vm14, %v636_v7, %v633_v11 }
 0x169   :  { %v1811_v25 = vpack.c.bf16 %v615_v20, %v616_v14  ;;  %v1817_v26 = vpack.c.bf16 %v639_v22, %v640_v23  ;;  %v1820_v27 = vpack.c.bf16 %v641_v24, %v638_v18  ;;  %v614_v28 = vsel %vm612_vm12, %v609_v10, %v610_v1 }
 0x16a   :  { %v1814_v30 = vpack.c.bf16 %v613_v19, %v614_v28  ;;  %v2163_v10 = vadd.f32 %v1735_v4, %v2641_v55  ;;  %v2193_v13 = vadd.f32 %v1735_v4, %v2649_v62  ;;  %vm987_vm12 = vcmp.lt.s32.totalorder %v2567_v16, 4  ;;  %v2313_v16 = vld [vmem:[#allocation7 + $0x210] sm:$0xff]  }
 0x16b   :  { %1812 = vmatmul.mubr.msk.bf16.vlgmr.msra.gmra.mrb[8].mxu1 %vm2669_vm4, %v1811_v25  ;;  %2102 = vmatprep.mubr.msk.bf16.mxu0 %vm1816_vm6, %v1817_v26  ;;  %vm1009_vm14 = vcmp.lt.s32.totalorder %v2584_v36, 12  ;;  %vm1856_vm4 = vmpackc.low %vm1011_vm1, %vm2453_vm5  ;;  %vm994_vm6 = vcmp.ge.s32.totalorder %v2592_v44, 4  ;;  %v2314_v44 = vld [vmem:[#allocation7 + $0x1e0] sm:$0xff]  }
 0x16c   :  { %901 = vmatprep.mubr.bf16.mxu1 %v710_v17  ;;  %2103 = vmatmul.mubr.msk.bf16.vlgmr.msra.gmra.mrb[8].mxu0 %vm1819_vm7, %v1820_v27  ;;  %vm1853_vm2 = vmpackc.low %vm1009_vm14, %vm2453_vm5 }
 0x16d   :  { %1971 = vmatpush3.bf16.msra.mxu1 %v2281_v29  ;;  %2107 = vmatpush3.bf16.msra.mxu0 %v2633_v32  ;;  %v2291_v32 = vld [vmem:[#allocation7 + $0x120] sm:$0xff]   ;;  %vm1850_vm7 = vmpackc.low %vm2453_vm5, %vm994_vm6 }
 0x16e   :  { %1972 = vmatprep.subr.bf16.mxu1 %v2282_v31  ;;  %2108 = vmatprep.subr.bf16.mxu0 %v2283_v33  ;;  %v2148_v31 = vadd.f32 %v1735_v4, %v2639_v51 }
 0x171   :  { %1973 = vmatpush3.bf16.msra.mxu1 %v2284_v34  ;;  %2109 = vmatpush3.bf16.msra.mxu0 %v2283_v33 }
 0x172   :  { %1974 = vmatprep.subr.bf16.mxu1 %v2285_v35  ;;  %2110 = vmatprep.subr.bf16.mxu0 %v2286_v37  ;;  %v2178_v35 = vadd.f32 %v1735_v4, %v2645_v59  ;;  %v2320_v4 = vld [vmem:[#allocation7 + $0x1f0] sm:$0xff]  }
 0x173   :  { %1815 = vmatmul.mubr.msk.bf16.gmra.mrb[12].mxu1 %vm1813_vm9, %v1814_v30 }
 0x175   :  { %1975 = vmatpush3.bf16.msra.mxu1 %v2287_v38  ;;  %2111 = vmatpush3.bf16.msra.mxu0 %v2286_v37 }
 0x176   :  { %1976 = vmatprep.subr.bf16.mxu1 %v2288_v39  ;;  %2112 = vmatprep.subr.bf16.mxu0 %v2289_v40 }
 0x179   :  { %1977 = vmatpush3.bf16.msra.mxu1 %v2290_v41  ;;  %2113 = vmatpush3.bf16.msra.mxu0 %v2289_v40 }
 0x17a   :  { %1978 = vmatprep.subr.bf16.mxu1 %v2291_v32  ;;  %2114 = vmatprep.subr.bf16.mxu0 %v2292_v42 }
 0x17d   :  { %1979 = vmatpush3.bf16.msra.mxu1 %v2293_v43  ;;  %2115 = vmatpush3.bf16.msra.mxu0 %v2292_v42 }
 0x17e   :  { %1980 = vmatprep.subr.bf16.mxu1 %v2294_v45  ;;  %2116 = vmatprep.subr.bf16.mxu0 %v2295_v46 }
 0x181   :  { %1981 = vmatpush3.bf16.msra.mxu1 %v2296_v47  ;;  %2117 = vmatpush3.bf16.msra.mxu0 %v2295_v46 }
 0x182   :  { %1982 = vmatprep.subr.bf16.mxu1 %v2297_v48  ;;  %2118 = vmatprep.subr.bf16.mxu0 %v2298_v49 }
 0x185   :  { %1983 = vmatpush3.bf16.msra.mxu1 %v2299_v50  ;;  %2119 = vmatpush3.bf16.msra.mxu0 %v2298_v49 }
 0x186   :  { %1984 = vmatprep.subr.bf16.mxu1 %v2300_v52  ;;  %2120 = vmatprep.subr.bf16.mxu0 %v2301_v54  ;;  %v2305_v52 = vld [vmem:[#allocation7 + $0x1c8] sm:$0xff]  }
 0x189   :  { %1985 = vmatpush3.bf16.msra.mxu1 %v2302_v56  ;;  %2121 = vmatpush3.bf16.msra.mxu0 %v2301_v54  ;;  %v2310_v54 = vld [vmem:[#allocation7 + $0x208] sm:$0xff]  }
 0x18a   :  { %2008 = vmatprep.subr.bf16.mxu1 %v2303_v57  ;;  %2126 = vmatprep.subr.bf16.mxu0 %v2698_v58  ;;  %v2306_v56 = vld [vmem:[#allocation7 + $0x188] sm:$0xff]   ;;  %v2308_v57 = vld [vmem:[#allocation7 + $0x1d0] sm:$0xff]  }
 0x23e   :  { %v1948_v60 = vpop.f32.mrb[8].mxu1 }
 0x23f   :  { %v1949_v61 = vpop.f32.mrb[9].mxu1  ;;  %v2104_v63 = vpop.f32.mrb[8].mxu0 }
 0x240   :  { %v1950_v1 = vadd.f32 %v1949_v61, %v1948_v60  ;;  %v1951_v2 = vpop.f32.mrb[10].mxu1  ;;  %v944_v3 = vpop.f32.mrb[9].mxu0  ;;  %v2309_v60 = vld [vmem:[#allocation7 + $0x190] sm:$0xff]   ;;  %v2311_v61 = vld [vmem:[#allocation7 + $0x1d8] sm:$0xff]  }
 0x241   :  { %v1952_v5 = vpop.f32.mrb[11].mxu1  ;;  %v2105_v6 = vpop.f32.mrb[10].mxu0 }
 0x242   :  { %v896_v7 = vadd.f32 %v1950_v1, %v1785_v0  ;;  %v1953_v8 = vadd.f32 %v1952_v5, %v1951_v2  ;;  %v947_v9 = vpop.f32.mrb[11].mxu0  ;;  %v2317_v1 = vld [vmem:[#allocation7 + $0x1e8] sm:$0xff]   ;;  %v2321_v5 = vld [vmem:[#allocation7 + $0x1b0] sm:$0xff]  }
 0x243   :  { %v2318_v2 = vld [vmem:[#allocation7 + $0x1a8] sm:$0xff]  }
 0x244   :  { %v945_v11 = vadd.f32 %v944_v3, %v896_v7  ;;  %v899_v12 = vadd.f32 %v1953_v8, %v1785_v0  ;;  %v2319_v3 = vld [vmem:[#allocation7 + $0x220] sm:$0xff]   ;;  %v2323_v7 = vld [vmem:[#allocation7 + $0x1f8] sm:$0xff]  }
 0x245   :  { %v2324_v8 = vld [vmem:[#allocation7 + $0x1b8] sm:$0xff]  }
 0x246   :  { %v2709_v14 = vadd.f32 %v2163_v10, %v945_v11  ;;  %v975_v15 = vmul.f32 0.2, %v945_v11  ;;  %v948_v17 = vadd.f32 %v947_v9, %v899_v12  ;;  %v1954_v18 = vpop.f32.mrb[12].mxu1  ;;  %vm971_vm10 = vcmp.gt.f32.partialorder %v945_v11, 0.0  ;;  %v2325_v9 = vld [vmem:[#allocation7 + $0x230] sm:$0xff]   ;;  %v2326_v10 = vld [vmem:[#allocation7 + $0x238] sm:$0xff]  }
 0x247   :  { %v1955_v19 = vpop.f32.mrb[13].mxu1 }
 0x248   :  { %v2711_v20 = vadd.f32 %v2193_v13, %v948_v17  ;;  %v976_v22 = vmul.f32 0.2, %v948_v17  ;;  %v1956_v23 = vadd.f32 %v1955_v19, %v1954_v18  ;;  %v1957_v24 = vpop.f32.mrb[14].mxu1  ;;  %vm972_vm11 = vcmp.gt.f32.partialorder %v948_v17, 0.0 }
 0x249   :  { %v1958_v25 = vpop.f32.mrb[15].mxu1  ;;  %v979_v26 = vsel %vm971_vm10, %v945_v11, %v975_v15  ;;  %v1822_v15 = vld [vmem:[%s2762_s3 + $0x2] ss:$0 sm:$0xff] }
 0x24a   :  { %v904_v55 = vadd.f32 %v1956_v23, %v1785_v0  ;;  %v1959_v27 = vadd.f32 %v1958_v25, %v1957_v24  ;;  %v980_v28 = vsel %vm972_vm11, %v948_v17, %v976_v22  ;;  %v983_v62 = vrot.slane %v979_v26, 4 }
 0x24b   :  { %v984_v29 = vrot.slane %v980_v28, 4  ;;  %v1074_v30 = vpack.c.bf16 %v980_v28, %v979_v26 }
 0x24c   :  { %v953_v33 = vadd.f32 %v2104_v63, %v904_v55  ;;  %v907_v34 = vadd.f32 %v1959_v27, %v1785_v0  ;;  %v2312_v63 = vld [vmem:[#allocation7 + $0x198] sm:$0xff]   ;;  %v2315_v0 = vld [vmem:[#allocation7 + $0x1a0] sm:$0xff]  }
 0x24d   :  { %1260 = vmatprep.mubr.bf16.mxu1 %v1074_v30  ;;  %v990_v37 = vsel %vm987_vm12, %v983_v62, %v984_v29 }
 0x24e   :  { %v2718_v38 = vadd.f32 %v2148_v31, %v953_v33  ;;  %vm973_vm13 = vcmp.gt.f32.partialorder %v953_v33, 0.0  ;;  %v977_v39 = vmul.f32 0.2, %v953_v33  ;;  %v956_v40 = vadd.f32 %v2105_v6, %v907_v34  ;;  %v2322_v6 = vld [vmem:[#allocation7 + $0x228] sm:$0xff]  }
 0x250   :  { %v981_v41 = vsel %vm973_vm13, %v953_v33, %v977_v39  ;;  %v2721_v32 = vadd.f32 %v2178_v35, %v956_v40  ;;  %vm974_vm15 = vcmp.gt.f32.partialorder %v956_v40, 0.0  ;;  %v978_v51 = vmul.f32 0.2, %v956_v40 }
 0x251   :  { %v985_v42 = vrot.slane %v981_v41, 4 }
 0x252   :  { %v982_v59 = vsel %vm974_vm15, %v956_v40, %v978_v51 }
 0x253   :  { %v986_v43 = vrot.slane %v982_v59, 4  ;;  %v989_v45 = vsel %vm987_vm12, %v984_v29, %v985_v42  ;;  %v1077_v46 = vpack.c.bf16 %v982_v59, %v981_v41 }
 0x254   :  { %v1854_v47 = vpack.c.bf16 %v989_v45, %v990_v37 }
 0x255   :  { %v988_v36 = vsel %vm987_vm12, %v985_v42, %v986_v43  ;;  %v991_v48 = vsel %vm987_vm12, %v986_v43, %v983_v62  ;;  %v2454_v43 = vmov 0.0  }
 0x256   :  { %v1848_v53 = vpack.c.bf16 %v990_v37, %v991_v48  ;;  %2122 = vmatprep.mubr.msk.bf16.mxu0 %vm1853_vm2, %v1854_v47  ;;  %v1857_v49 = vpack.c.bf16 %v991_v48, %v988_v36  ;;  %v1851_v50 = vpack.c.bf16 %v988_v36, %v989_v45 }
 0x258   :  { %1849 = vmatmul.mubr.msk.bf16.vlgmr.msra.gmra.mrb[16].mxu1 %vm1847_vm3, %v1848_v53  ;;  %2123 = vmatmul.mubr.msk.bf16.vlgmr.msra.gmra.mrb[12].mxu0 %vm1856_vm4, %v1857_v49 }
 0x259   :  { %1268 = vmatprep.mubr.bf16.mxu1 %v1077_v46  ;;  %2009 = vmatpush3.bf16.msra.mxu1 %v2304_v21 }
 0x25a   :  { %2010 = vmatprep.subr.bf16.mxu1 %v2305_v52  ;;  %2127 = vmatpush3.bf16.msra.mxu0 %v2698_v58  ;;  %v2316_v58 = vld [vmem:[#allocation7 + $0x218] sm:$0xff]  }
 0x25b   :  { %2128 = vmatprep.subr.bf16.mxu0 %v2310_v54 }
 0x25d   :  { %2011 = vmatpush3.bf16.msra.mxu1 %v2306_v56 }
 0x25e   :  { %2012 = vmatprep.subr.bf16.mxu1 %v2308_v57  ;;  %2129 = vmatpush3.bf16.msra.mxu0 %v2310_v54 }
 0x25f   :  { %2130 = vmatprep.subr.bf16.mxu0 %v2313_v16 }
 0x260   :  { %1852 = vmatmul.mubr.msk.bf16.gmra.mrb[20].mxu1 %vm1850_vm7, %v1851_v50 }
 0x261   :  { %2013 = vmatpush3.bf16.msra.mxu1 %v2309_v60 }
 0x262   :  { %2014 = vmatprep.subr.bf16.mxu1 %v2311_v61  ;;  %2131 = vmatpush3.bf16.msra.mxu0 %v2313_v16 }
 0x263   :  { %2132 = vmatprep.subr.bf16.mxu0 %v2316_v58 }
 0x265   :  { %2015 = vmatpush3.bf16.msra.mxu1 %v2312_v63 }
 0x266   :  { %2016 = vmatprep.subr.bf16.mxu1 %v2314_v44  ;;  %2133 = vmatpush3.bf16.msra.mxu0 %v2316_v58 }
 0x267   :  { %2134 = vmatprep.subr.bf16.mxu0 %v2319_v3 }
 0x269   :  { %2017 = vmatpush3.bf16.msra.mxu1 %v2315_v0 }
 0x26a   :  { %2018 = vmatprep.subr.bf16.mxu1 %v2317_v1  ;;  %2135 = vmatpush3.bf16.msra.mxu0 %v2319_v3 }
 0x26b   :  { %2136 = vmatprep.subr.bf16.mxu0 %v2322_v6 }
 0x26d   :  { %2019 = vmatpush3.bf16.msra.mxu1 %v2318_v2 }
 0x26e   :  { %2020 = vmatprep.subr.bf16.mxu1 %v2320_v4  ;;  %2137 = vmatpush3.bf16.msra.mxu0 %v2322_v6 }
 0x26f   :  { %2138 = vmatprep.subr.bf16.mxu0 %v2325_v9 }
 0x271   :  { %2021 = vmatpush3.bf16.msra.mxu1 %v2321_v5 }
 0x272   :  { %2022 = vmatprep.subr.bf16.mxu1 %v2323_v7  ;;  %2139 = vmatpush3.bf16.msra.mxu0 %v2325_v9 }
 0x273   :  { %2140 = vmatprep.subr.bf16.mxu0 %v2326_v10 }
 0x275   :  { %2023 = vmatpush3.bf16.msra.mxu1 %v2324_v8 }
 0x276   :  { %2141 = vmatpush3.bf16.msra.mxu0 %v2326_v10 }
 0x32b   :  { %v1986_v11 = vpop.f32.mrb[16].mxu1  ;;  %v2124_v12 = vpop.f32.mrb[12].mxu0 }
 0x32c   :  { %v1987_v13 = vpop.f32.mrb[17].mxu1  ;;  %v1311_v17 = vpop.f32.mrb[13].mxu0 }
 0x32d   :  { %v1988_v18 = vadd.f32 %v1987_v13, %v1986_v11  ;;  %v1989_v19 = vpop.f32.mrb[18].mxu1  ;;  %v2125_v22 = vpop.f32.mrb[14].mxu0 }
 0x32e   :  { %v1990_v23 = vpop.f32.mrb[19].mxu1  ;;  %v1314_v24 = vpop.f32.mrb[15].mxu0 }
 0x32f   :  { %v1263_v25 = vadd.f32 %v1988_v18, %v1822_v15  ;;  %v1991_v26 = vadd.f32 %v1990_v23, %v1989_v19 }
 0x331   :  { %v1312_v55 = vadd.f32 %v1311_v17, %v1263_v25  ;;  %v1266_v27 = vadd.f32 %v1991_v26, %v1822_v15 }
 0x333   :  { %v2169_v28 = vadd.f32 %v2709_v14, %v1312_v55  ;;  %v1342_v62 = vmul.f32 0.2, %v1312_v55  ;;  %v1315_v29 = vadd.f32 %v1314_v24, %v1266_v27  ;;  %v1992_v30 = vpop.f32.mrb[20].mxu1  ;;  %vm1338_vm5 = vcmp.gt.f32.partialorder %v1312_v55, 0.0 }
 0x334   :  { %v1993_v31 = vpop.f32.mrb[21].mxu1 }
 0x335   :  { %v2199_v33 = vadd.f32 %v2711_v20, %v1315_v29  ;;  %v1343_v34 = vmul.f32 0.2, %v1315_v29  ;;  %v1994_v35 = vadd.f32 %v1993_v31, %v1992_v30  ;;  %v1995_v37 = vpop.f32.mrb[22].mxu1  ;;  %vm1339_vm8 = vcmp.gt.f32.partialorder %v1315_v29, 0.0 }
 0x336   :  { %v1996_v39 = vpop.f32.mrb[23].mxu1  ;;  %v1346_v40 = vsel %vm1338_vm5, %v1312_v55, %v1342_v62 }
 0x337   :  { %v1271_v41 = vadd.f32 %v1994_v35, %v1822_v15  ;;  %v1997_v51 = vadd.f32 %v1996_v39, %v1995_v37  ;;  %v1347_v42 = vsel %vm1339_vm8, %v1315_v29, %v1343_v34  ;;  %v1431_v47 = vpack.c.bf16 %v1346_v40, %v2454_v43 }
 0x338   :  { %v1432_v59 = vpack.c.bf16 %v1347_v42, %v1346_v40  ;;  %v1433_v45 = vpack.c.bf16 %v2454_v43, %v1347_v42 }
 0x339   :  { %v1320_v14 = vadd.f32 %v2124_v12, %v1271_v41  ;;  %v1274_v46 = vadd.f32 %v1997_v51, %v1822_v15 }
 0x33a   :  { %1618 = vmatprep.mubr.bf16.mxu1 %v1432_v59  ;;  %2142 = vmatprep.mubr.bf16.mxu0 %v1433_v45 }
 0x33b   :  { %v2154_v36 = vadd.f32 %v2718_v38, %v1320_v14  ;;  %v1323_v20 = vadd.f32 %v2125_v22, %v1274_v46  ;;  %1619 = vmatmul.mubr.bf16.vlgmr.msra.gmra.mrb[24].mxu1 %v1431_v47  ;;  %vm1340_vm9 = vcmp.gt.f32.partialorder %v1320_v14, 0.0  ;;  %v1344_v48 = vmul.f32 0.2, %v1320_v14  ;;  %v1859_v38 = vld [vmem:[%s2762_s3 + $0x3] ss:$0 sm:$0xff]  ;;  %s2455_s3 = smov [#allocation10]  }
 0x33c   :  { %s1721_s28 = sshll.u32 %s2455_s3, 4  ;;  %s1722_s28 = int_to_ptr.vmem [resolvable:$true] %s1721_s28 }
 0x33d   :  { %v2184_v21 = vadd.f32 %v2721_v32, %v1323_v20  ;;  %vm1341_vm10 = vcmp.gt.f32.partialorder %v1323_v20, 0.0  ;;  %v1345_v53 = vmul.f32 0.2, %v1323_v20  ;;  %v1348_v49 = vsel %vm1340_vm9, %v1320_v14, %v1344_v48  ;;  %s2417_s29 = scalar_lea.vmem %s1722_s28, 512  ;;  %p2422_p5 = scmp.lt.s32.totalorder %s1722_s28, %s1722_s28 }
 0x33e   :  { %v1434_v56 = vpack.c.bf16 %v1348_v49, %v2454_v43  ;;  %p2418_p4 = scmp.ne.s32.totalorder %s1722_s28, %s2417_s29  ;;  %p2423_p6 = scmp.lt.s32.totalorder %s2417_s29, %s2417_s29 }
 0x33f   :  { %v1349_v50 = vsel %vm1341_vm10, %v1323_v20, %v1345_v53 }
 0x340   :  { %v1435_v52 = vpack.c.bf16 %v1349_v50, %v1348_v49  ;;  %v1436_v54 = vpack.c.bf16 %v2454_v43, %v1349_v50  ;;  %p2424_p7 = por %p2423_p6, %p2422_p5 }
 0x342   :  { %1626 = vmatprep.mubr.bf16.mxu1 %v1435_v52  ;;  %2143 = vmatmul.mubr.bf16.vlgmr.msra.gmra.mrb[0].mxu0 %v1436_v54  ;;  %p2425_p8 = pnand %p2424_p7, %p2418_p4 }
 0x343   :  { %1627 = vmatmul.mubr.bf16.gmra.mrb[28].mxu1 %v1434_v56 }
 0x40e   :  { %v2024_v57 = vpop.f32.mrb[24].mxu1 }
 0x40f   :  { %v2025_v16 = vpop.f32.mrb[25].mxu1 }
 0x410   :  { %v2026_v60 = vadd.f32 %v2025_v16, %v2024_v57  ;;  %v2027_v61 = vpop.f32.mrb[26].mxu1 }
 0x411   :  { %v2028_v63 = vpop.f32.mrb[27].mxu1 }
 0x412   :  { %v1621_v32 = vadd.f32 %v2026_v60, %v1859_v38  ;;  %v2029_v44 = vadd.f32 %v2028_v63, %v2027_v61 }
 0x414   :  { %v2172_v0 = vadd.f32 %v2169_v28, %v1621_v32  ;;  %v1624_v58 = vadd.f32 %v2029_v44, %v1859_v38 }
 0x415   :  { %v2144_v1 = vpop.f32.mrb[0].mxu0 }
 0x416   :  { %v2202_v2 = vadd.f32 %v2199_v33, %v1624_v58  ;;  %v2030_v3 = vpop.f32.mrb[28].mxu1  ;;  %v1669_v4 = vpop.f32.mrb[1].mxu0 }
 0x417   :  { %v2175_v5 = vadd.f32 %v2172_v0, %v1669_v4  ;;  %v2031_v6 = vpop.f32.mrb[29].mxu1  ;;  %v2145_v7 = vpop.f32.mrb[2].mxu0 }
 0x418   :  { %v2032_v8 = vadd.f32 %v2031_v6, %v2030_v3  ;;  %v2033_v9 = vpop.f32.mrb[30].mxu1  ;;  %v1672_v10 = vpop.f32.mrb[3].mxu0 }
 0x419   :  { %vm1700_vm11 = vcmp.gt.f32.partialorder %v2175_v5, 0.0  ;;  %v1704_v11 = vmul.f32 0.2, %v2175_v5  ;;  %v2205_v12 = vadd.f32 %v2202_v2, %v1672_v10  ;;  %v2034_v13 = vpop.f32.mrb[31].mxu1 }
 0x41a   :  { %v1629_v15 = vadd.f32 %v2032_v8, %v1859_v38  ;;  %v2035_v17 = vadd.f32 %v2034_v13, %v2033_v9 }
 0x41b   :  { %v1708_v18 = vsel %vm1700_vm11, %v2175_v5, %v1704_v11  ;;  %vm1701_vm12 = vcmp.gt.f32.partialorder %v2205_v12, 0.0  ;;  %v1705_v19 = vmul.f32 0.2, %v2205_v12 }
 0x41c   :  { %1712 = vst [vmem:[#allocation10] sm:$0xff] %v1708_v18  ;;  %v2157_v22 = vadd.f32 %v2154_v36, %v1629_v15  ;;  %v1632_v23 = vadd.f32 %v2035_v17, %v1859_v38 }
 0x41d   :  { %v1709_v24 = vsel %vm1701_vm12, %v2205_v12, %v1705_v19 }
 0x41e   :  { %v2160_v25 = vadd.f32 %v2157_v22, %v2144_v1  ;;  %1713 = vst [vmem:[#allocation10 + $0x8] sm:$0xff] %v1709_v24  ;;  %v2187_v26 = vadd.f32 %v2184_v21, %v1632_v23 }
 0x420   :  { %v2190_v55 = vadd.f32 %v2187_v26, %v2145_v7  ;;  %vm1702_vm13 = vcmp.gt.f32.partialorder %v2160_v25, 0.0  ;;  %v1706_v27 = vmul.f32 0.2, %v2160_v25 }
 0x422   :  { %vm1703_vm14 = vcmp.gt.f32.partialorder %v2190_v55, 0.0  ;;  %v1707_v28 = vmul.f32 0.2, %v2190_v55  ;;  %v1710_v62 = vsel %vm1702_vm13, %v2160_v25, %v1706_v27 }
 0x423   :  { %1714 = vst [vmem:[#allocation10 + $0x10] sm:$0xff] %v1710_v62 }
 0x424   :  { %v1711_v29 = vsel %vm1703_vm14, %v2190_v55, %v1707_v28 }
 0x425   :  { %1715 = vst [vmem:[#allocation10 + $0x18] sm:$0xff] %v1711_v29 }
 0x426   :  { %2428 = shalt.err (!%p2425_p8)
}
 0x427   :  { %s2429_s8 = scalar_lea.hbm %s2765_s6, 512 }
 0x428   :  { %p2430_p9 = scmp.ne.s32.totalorder %s2765_s6, %s2429_s8  ;;  %p2433_p10 = scmp.lt.u32.totalorder %s2429_s8, %s2765_s6 }
 0x42a   :  { %p2435_p11 = pnand %p2433_p10, %p2430_p9 }
 0x42c   :  { %2438 = shalt.err (!%p2435_p11)
}
 0x42d   :  { %s2456_s13 = smov 128   ;;  %s2457_s14 = smov 8  }
 0x42e   :  { %1727 = dma.vmem_to_hbm [thread:$0]  %s1722_s28, 512, %s2765_s6, [#allocation4], %s2456_s13, %s2456_s13, %s2457_s14  }
 0x42f   :  { %2445 = dma.done.wait [#allocation4], 512  }
 0x430   :  { %2446 = vsyncadd [#allocation4], 4294966784 }
 0x431   :  { %1731 = vsyncpa [#allocation3], 1 }
 0x432   :  { %1732 = vsyncpa [#allocation6], 1 }
 0x433   :  { %1733 = vsyncpa [#allocation9], 1 }
 0x434   :  { %1734 = vsyncpa [#allocation4], 1 }

</bundles_post_ra>
